<compile_context>
chip_gen: v6e
topology: v6e:2x2x1
jax: 0.10.0
libtpu: 0.0.40
codegen_flags: <defaults>
</compile_context>

<pallas_src>
import functools

import jax
import jax.numpy as jnp
from jax.experimental import pallas as pl
from jax.experimental.pallas import tpu as pltpu

HIDDEN = (500, 300, 100, 50, 30)
_LANE = 128            # inner feature dims padded to multiples of 128 lanes
_MIN_TILE = 16         # bf16 packs 16 sublanes per vreg
_MAX_BATCH_TILE = 2048  # per-step VMEM ~9 MiB at this tile (see header note)


def _round_up(n, m):
    return ((n + m - 1) // m) * m


def _cdiv(a, b):
    return -(-a // b)


def _pad_to(x, rows, cols):
    """Zero-pad a 2D array up to (rows, cols)."""
    r, c = x.shape
    return jnp.pad(x, ((0, rows - r), (0, cols - c)))


def _choose_tiling(batch):
    """Pick (batch_tile, padded_batch).

    - batch rounded up to a multiple of 16 rows (bf16 sublane granule),
    - >= 2 grid steps whenever the batch allows it (keeps both v7x TCs busy),
    - tile capped at _MAX_BATCH_TILE; padding waste is <= 16 rows per step
      (vs. up to ~2x work with the old power-of-two bucketing).
    """
    b16 = _round_up(max(int(batch), 1), _MIN_TILE)
    if b16 <= 2 * _MIN_TILE:          # too small to split usefully
        return b16, b16
    nsteps = max(2, _cdiv(b16, _MAX_BATCH_TILE))
    tb = _round_up(_cdiv(b16, nsteps), _MIN_TILE)
    return tb, nsteps * tb


def init_params(key, input_size, num_classes):
    """Deterministic init mimicking nn.Linear's U(-1/sqrt(fan_in), ...).

    Weights are stored as [in, out] (transposed vs. PyTorch's [out, in]).
    Biases are stored as [1, out] for clean 2D broadcasting inside the kernel.
    """
    dims = (input_size,) + HIDDEN + (num_classes,)
    params = []
    for i in range(len(dims) - 1):
        fan_in, fan_out = dims[i], dims[i + 1]
        key, kw, kb = jax.random.split(key, 3)
        bound = 1.0 / (fan_in ** 0.5)
        w = jax.random.uniform(kw, (fan_in, fan_out), jnp.float32, -bound, bound)
        b = jax.random.uniform(kb, (1, fan_out), jnp.float32, -bound, bound)
        params.append((w, b))
    return params


def prepare_params(params):
    """One-time prep (outside the forward path).

    Inner feature dims are zero-padded to multiples of 128 lanes; weights are
    cast to bf16 once (MXU-native, half the DMA bytes); biases stay f32 (added
    to the f32 accumulator).  The FIRST layer keeps its real input size so x
    needs no feature padding, and the LAST layer keeps its real output size so
    the kernel writes only real logit columns.  Zero padding + ReLU(0)=0 keeps
    the real columns exact.
    """
    prepped = []
    n = len(params)
    prev = params[0][0].shape[0]                 # real input size, unpadded
    for idx, (w, b) in enumerate(params):
        out_dim = w.shape[1]
        out_p = out_dim if idx == n - 1 else _round_up(out_dim, _LANE)
        w_p = _pad_to(w, prev, out_p).astype(jnp.bfloat16)
        b_p = _pad_to(b, 1, out_p).astype(jnp.float32)
        prepped.append((w_p, b_p))
        prev = out_p
    return tuple(prepped)


def _mlp_kernel(x_ref,
                w1, b1, w2, b2, w3, b3, w4, b4, w5, b5, w6, b6,
                out_ref):
    """Fused (Linear -> ReLU) x5 -> Linear on one batch tile.

    x arrives as f32 and is cast to bf16 in-kernel; bf16 MXU matmuls with f32
    accumulation; activations re-cast to bf16 between layers (halves
    intermediate VMEM store traffic); final logits stored in f32.
    """
    def linear(h, w_ref, b_ref):
        return jnp.dot(h, w_ref[...],
                       preferred_element_type=jnp.float32) + b_ref[...]

    def relu_bf16(a):
        return jnp.maximum(a, 0.0).astype(jnp.bfloat16)

    h = x_ref[...].astype(jnp.bfloat16)   # in-kernel cast (no wrapper cast op)
    h = relu_bf16(linear(h, w1, b1))
    h = relu_bf16(linear(h, w2, b2))
    h = relu_bf16(linear(h, w3, b3))
    h = relu_bf16(linear(h, w4, b4))
    h = relu_bf16(linear(h, w5, b5))
    out_ref[...] = linear(h, w6, b6).astype(out_ref.dtype)


@jax.jit
def red_neuronal5_relu(x, prepped_params):
    """Forward pass of RedNeuronal5_ReLU as a single fused Pallas TPU kernel.

    x: [batch, input_size] float32
    prepped_params: output of prepare_params()
    returns: [batch, num_classes] float32 logits (no final activation)
    """
    batch, in_dim = x.shape
    assert in_dim == prepped_params[0][0].shape[0], "input_size mismatch"
    num_classes = prepped_params[-1][0].shape[1]

    tb, batch_p = _choose_tiling(batch)

    # Only the batch rows are padded (f32, no cast, only when needed).
    x_p = x if batch_p == batch else jnp.pad(x, ((0, batch_p - batch), (0, 0)))

    flat_args = []
    in_specs = [pl.BlockSpec((tb, in_dim), lambda i: (i, 0))]
    for (w, b) in prepped_params:
        flat_args.append(w)
        flat_args.append(b)
        # Constant block index -> weights/biases stay VMEM-resident across
        # batch-grid iterations (no re-DMA per step).  They total ~0.65 MiB
        # bf16, so default double-buffering is well within the VMEM budget.
        in_specs.append(pl.BlockSpec(w.shape, lambda i: (0, 0)))
        in_specs.append(pl.BlockSpec(b.shape, lambda i: (0, 0)))

    out = pl.pallas_call(
        _mlp_kernel,
        out_shape=jax.ShapeDtypeStruct((batch_p, num_classes), jnp.float32),
        grid=(batch_p // tb,),
        in_specs=in_specs,
        out_specs=pl.BlockSpec((tb, num_classes), lambda i: (i, 0)),
        compiler_params=pltpu.CompilerParams(
            dimension_semantics=("parallel",)),
    )(x_p, *flat_args)

    return out if batch_p == batch else out[:batch]


def _reference_f32(x, params):
    """Pure f32 reference (matches the PyTorch module semantics)."""
    h = x
    for i, (w, b) in enumerate(params):
        h = h @ w + b[0]
        if i < len(params) - 1:
            h = jnp.maximum(h, 0.0)
    return h


def _reference_bf16(x, params):
    """Reference mirroring the kernel's bf16 quantization (f32 accum)."""
    h = x.astype(jnp.bfloat16)
    for i, (w, b) in enumerate(params):
        h = jnp.dot(h, w.astype(jnp.bfloat16),
                    preferred_element_type=jnp.float32) + b[0]
        if i < len(params) - 1:
            h = jnp.maximum(h, 0.0).astype(jnp.bfloat16)
    return h


if __name__ == "__main__":
    input_size = 64
    num_classes = 10

    key = jax.random.PRNGKey(0)
    kx, kx2, kp = jax.random.split(key, 3)
    params = init_params(kp, input_size, num_classes)
    prepped = prepare_params(params)   # one-time padded/bf16 weights

    # Small batch: single grid step, padded rows discarded by the row slice.
    x = jax.random.normal(kx, (4, input_size), jnp.float32)
    out = jax.block_until_ready(red_neuronal5_relu(x, prepped))
    assert out.shape == (4, num_classes)

    ref_q = _reference_bf16(x, params)
    err_q = jnp.max(jnp.abs(out - ref_q))
    assert jnp.allclose(out, ref_q, atol=2e-3, rtol=2e-3), (
        f"max abs err vs bf16 reference: {err_q}")

    ref = _reference_f32(x, params)
    err = jnp.max(jnp.abs(out - ref))
    assert jnp.allclose(out, ref, atol=5e-2, rtol=5e-2), (
        f"max abs err vs f32 reference: {err}")

    # Larger batch: exercises the 2-step parallel grid + batch-row padding.
    x2 = jax.random.normal(kx2, (100, input_size), jnp.float32)
    out2 = jax.block_until_ready(red_neuronal5_relu(x2, prepped))
    assert out2.shape == (100, num_classes)
    ref2_q = _reference_bf16(x2, params)
    err2_q = jnp.max(jnp.abs(out2 - ref2_q))
    assert jnp.allclose(out2, ref2_q, atol=2e-3, rtol=2e-3), (
        f"max abs err vs bf16 reference (batch=100): {err2_q}")

    print("KERNEL_OK")
</pallas_src>

<mosaic_0001>
module attributes {stable_mosaic.version = 11 : i64} {
  func.func @_mlp_kernel(%arg0: i32, %arg1: memref<16x64xf32, #tpu.memory_space<vmem>>, %arg2: memref<64x512xbf16, #tpu.memory_space<vmem>>, %arg3: memref<1x512xf32, #tpu.memory_space<vmem>>, %arg4: memref<512x384xbf16, #tpu.memory_space<vmem>>, %arg5: memref<1x384xf32, #tpu.memory_space<vmem>>, %arg6: memref<384x128xbf16, #tpu.memory_space<vmem>>, %arg7: memref<1x128xf32, #tpu.memory_space<vmem>>, %arg8: memref<128x128xbf16, #tpu.memory_space<vmem>>, %arg9: memref<1x128xf32, #tpu.memory_space<vmem>>, %arg10: memref<128x128xbf16, #tpu.memory_space<vmem>>, %arg11: memref<1x128xf32, #tpu.memory_space<vmem>>, %arg12: memref<128x10xbf16, #tpu.memory_space<vmem>>, %arg13: memref<1x10xf32, #tpu.memory_space<vmem>>, %arg14: memref<16x10xf32, #tpu.memory_space<vmem>>) attributes {dimension_semantics = [#tpu.dimension_semantics<parallel>], iteration_bounds = array<i64: 1>, scalar_prefetch = 0 : i64, scratch_operands = 0 : i64, tpu.core_type = #tpu.core_type<tc>, window_params = [{transform_indices = @transform_0, window_bounds = array<i64: 16, 64>}, {pipeline_mode = #tpu.pipeline_mode<synchronous>, transform_indices = @transform_1, window_bounds = array<i64: 64, 512>}, {pipeline_mode = #tpu.pipeline_mode<synchronous>, transform_indices = @transform_2, window_bounds = array<i64: 1, 512>}, {pipeline_mode = #tpu.pipeline_mode<synchronous>, transform_indices = @transform_3, window_bounds = array<i64: 512, 384>}, {pipeline_mode = #tpu.pipeline_mode<synchronous>, transform_indices = @transform_4, window_bounds = array<i64: 1, 384>}, {pipeline_mode = #tpu.pipeline_mode<synchronous>, transform_indices = @transform_5, window_bounds = array<i64: 384, 128>}, {pipeline_mode = #tpu.pipeline_mode<synchronous>, transform_indices = @transform_6, window_bounds = array<i64: 1, 128>}, {pipeline_mode = #tpu.pipeline_mode<synchronous>, transform_indices = @transform_7, window_bounds = array<i64: 128, 128>}, {pipeline_mode = #tpu.pipeline_mode<synchronous>, transform_indices = @transform_8, window_bounds = array<i64: 1, 128>}, {pipeline_mode = #tpu.pipeline_mode<synchronous>, transform_indices = @transform_9, window_bounds = array<i64: 128, 128>}, {pipeline_mode = #tpu.pipeline_mode<synchronous>, transform_indices = @transform_10, window_bounds = array<i64: 1, 128>}, {pipeline_mode = #tpu.pipeline_mode<synchronous>, transform_indices = @transform_11, window_bounds = array<i64: 128, 10>}, {pipeline_mode = #tpu.pipeline_mode<synchronous>, transform_indices = @transform_12, window_bounds = array<i64: 1, 10>}, {transform_indices = @transform_13, window_bounds = array<i64: 16, 10>}]} {
    %c0 = arith.constant 0 : index
    %c0_0 = arith.constant 0 : index
    %0 = vector.load %arg1[%c0, %c0_0] : memref<16x64xf32, #tpu.memory_space<vmem>>, vector<16x64xf32>
    %1 = arith.truncf %0 : vector<16x64xf32> to vector<16x64xbf16>
    %c0_1 = arith.constant 0 : index
    %c0_2 = arith.constant 0 : index
    %2 = vector.load %arg2[%c0_1, %c0_2] : memref<64x512xbf16, #tpu.memory_space<vmem>>, vector<64x512xbf16>
    %cst = arith.constant dense<0.000000e+00> : vector<16x512xf32>
    %3 = tpu.matmul %1, %2, %cst {dimension_numbers = #tpu.dot_dimension_numbers<[1], [0], [0], [1], [0, 0, 1, 1], [], []>} : vector<16x64xbf16>, vector<64x512xbf16>, vector<16x512xf32> -> vector<16x512xf32>
    %c0_3 = arith.constant 0 : index
    %c0_4 = arith.constant 0 : index
    %4 = vector.load %arg3[%c0_3, %c0_4] : memref<1x512xf32, #tpu.memory_space<vmem>>, vector<1x512xf32>
    %5 = vector.broadcast %4 : vector<1x512xf32> to vector<16x512xf32>
    %6 = arith.addf %3, %5 : vector<16x512xf32>
    %cst_5 = arith.constant 0.000000e+00 : f32
    %7 = vector.broadcast %cst_5 : f32 to vector<16x512xf32>
    %8 = arith.maximumf %6, %7 : vector<16x512xf32>
    %9 = arith.truncf %8 : vector<16x512xf32> to vector<16x512xbf16>
    %c0_6 = arith.constant 0 : index
    %c0_7 = arith.constant 0 : index
    %10 = vector.load %arg4[%c0_6, %c0_7] : memref<512x384xbf16, #tpu.memory_space<vmem>>, vector<512x384xbf16>
    %cst_8 = arith.constant dense<0.000000e+00> : vector<16x384xf32>
    %11 = tpu.matmul %9, %10, %cst_8 {dimension_numbers = #tpu.dot_dimension_numbers<[1], [0], [0], [1], [0, 0, 1, 1], [], []>} : vector<16x512xbf16>, vector<512x384xbf16>, vector<16x384xf32> -> vector<16x384xf32>
    %c0_9 = arith.constant 0 : index
    %c0_10 = arith.constant 0 : index
    %12 = vector.load %arg5[%c0_9, %c0_10] : memref<1x384xf32, #tpu.memory_space<vmem>>, vector<1x384xf32>
    %13 = vector.broadcast %12 : vector<1x384xf32> to vector<16x384xf32>
    %14 = arith.addf %11, %13 : vector<16x384xf32>
    %cst_11 = arith.constant 0.000000e+00 : f32
    %15 = vector.broadcast %cst_11 : f32 to vector<16x384xf32>
    %16 = arith.maximumf %14, %15 : vector<16x384xf32>
    %17 = arith.truncf %16 : vector<16x384xf32> to vector<16x384xbf16>
    %c0_12 = arith.constant 0 : index
    %c0_13 = arith.constant 0 : index
    %18 = vector.load %arg6[%c0_12, %c0_13] : memref<384x128xbf16, #tpu.memory_space<vmem>>, vector<384x128xbf16>
    %cst_14 = arith.constant dense<0.000000e+00> : vector<16x128xf32>
    %19 = tpu.matmul %17, %18, %cst_14 {dimension_numbers = #tpu.dot_dimension_numbers<[1], [0], [0], [1], [0, 0, 1, 1], [], []>} : vector<16x384xbf16>, vector<384x128xbf16>, vector<16x128xf32> -> vector<16x128xf32>
    %c0_15 = arith.constant 0 : index
    %c0_16 = arith.constant 0 : index
    %20 = vector.load %arg7[%c0_15, %c0_16] : memref<1x128xf32, #tpu.memory_space<vmem>>, vector<1x128xf32>
    %21 = vector.broadcast %20 : vector<1x128xf32> to vector<16x128xf32>
    %22 = arith.addf %19, %21 : vector<16x128xf32>
    %cst_17 = arith.constant 0.000000e+00 : f32
    %23 = vector.broadcast %cst_17 : f32 to vector<16x128xf32>
    %24 = arith.maximumf %22, %23 : vector<16x128xf32>
    %25 = arith.truncf %24 : vector<16x128xf32> to vector<16x128xbf16>
    %c0_18 = arith.constant 0 : index
    %c0_19 = arith.constant 0 : index
    %26 = vector.load %arg8[%c0_18, %c0_19] : memref<128x128xbf16, #tpu.memory_space<vmem>>, vector<128x128xbf16>
    %cst_20 = arith.constant dense<0.000000e+00> : vector<16x128xf32>
    %27 = tpu.matmul %25, %26, %cst_20 {dimension_numbers = #tpu.dot_dimension_numbers<[1], [0], [0], [1], [0, 0, 1, 1], [], []>} : vector<16x128xbf16>, vector<128x128xbf16>, vector<16x128xf32> -> vector<16x128xf32>
    %c0_21 = arith.constant 0 : index
    %c0_22 = arith.constant 0 : index
    %28 = vector.load %arg9[%c0_21, %c0_22] : memref<1x128xf32, #tpu.memory_space<vmem>>, vector<1x128xf32>
    %29 = vector.broadcast %28 : vector<1x128xf32> to vector<16x128xf32>
    %30 = arith.addf %27, %29 : vector<16x128xf32>
    %cst_23 = arith.constant 0.000000e+00 : f32
    %31 = vector.broadcast %cst_23 : f32 to vector<16x128xf32>
    %32 = arith.maximumf %30, %31 : vector<16x128xf32>
    %33 = arith.truncf %32 : vector<16x128xf32> to vector<16x128xbf16>
    %c0_24 = arith.constant 0 : index
    %c0_25 = arith.constant 0 : index
    %34 = vector.load %arg10[%c0_24, %c0_25] : memref<128x128xbf16, #tpu.memory_space<vmem>>, vector<128x128xbf16>
    %cst_26 = arith.constant dense<0.000000e+00> : vector<16x128xf32>
    %35 = tpu.matmul %33, %34, %cst_26 {dimension_numbers = #tpu.dot_dimension_numbers<[1], [0], [0], [1], [0, 0, 1, 1], [], []>} : vector<16x128xbf16>, vector<128x128xbf16>, vector<16x128xf32> -> vector<16x128xf32>
    %c0_27 = arith.constant 0 : index
    %c0_28 = arith.constant 0 : index
    %36 = vector.load %arg11[%c0_27, %c0_28] : memref<1x128xf32, #tpu.memory_space<vmem>>, vector<1x128xf32>
    %37 = vector.broadcast %36 : vector<1x128xf32> to vector<16x128xf32>
    %38 = arith.addf %35, %37 : vector<16x128xf32>
    %cst_29 = arith.constant 0.000000e+00 : f32
    %39 = vector.broadcast %cst_29 : f32 to vector<16x128xf32>
    %40 = arith.maximumf %38, %39 : vector<16x128xf32>
    %41 = arith.truncf %40 : vector<16x128xf32> to vector<16x128xbf16>
    %c0_30 = arith.constant 0 : index
    %c0_31 = arith.constant 0 : index
    %42 = vector.load %arg12[%c0_30, %c0_31] : memref<128x10xbf16, #tpu.memory_space<vmem>>, vector<128x10xbf16>
    %cst_32 = arith.constant dense<0.000000e+00> : vector<16x10xf32>
    %43 = tpu.matmul %41, %42, %cst_32 {dimension_numbers = #tpu.dot_dimension_numbers<[1], [0], [0], [1], [0, 0, 1, 1], [], []>} : vector<16x128xbf16>, vector<128x10xbf16>, vector<16x10xf32> -> vector<16x10xf32>
    %c0_33 = arith.constant 0 : index
    %c0_34 = arith.constant 0 : index
    %44 = vector.load %arg13[%c0_33, %c0_34] : memref<1x10xf32, #tpu.memory_space<vmem>>, vector<1x10xf32>
    %45 = vector.broadcast %44 : vector<1x10xf32> to vector<16x10xf32>
    %46 = arith.addf %43, %45 : vector<16x10xf32>
    %c0_35 = arith.constant 0 : index
    %c0_36 = arith.constant 0 : index
    %47 = vector.load %arg14[%c0_35, %c0_36] : memref<16x10xf32, #tpu.memory_space<vmem>>, vector<16x10xf32>
    tpu.vector_store %arg14[%c0_35, %c0_36], %46 {strides = array<i32>} : memref<16x10xf32, #tpu.memory_space<vmem>>, vector<16x10xf32>,
    return
  }
  func.func @transform_0(%arg0: i32) -> (i32, i32) {
    %c0_i32 = arith.constant 0 : i32
    %c0_i32_0 = arith.constant 0 : i32
    return %arg0, %c0_i32 : i32, i32
  }
  func.func @transform_1(%arg0: i32) -> (i32, i32) {
    %c0_i32 = arith.constant 0 : i32
    %c0_i32_0 = arith.constant 0 : i32
    %c0_i32_1 = arith.constant 0 : i32
    return %c0_i32, %c0_i32_0 : i32, i32
  }
  func.func @transform_2(%arg0: i32) -> (i32, i32) {
    %c0_i32 = arith.constant 0 : i32
    %c0_i32_0 = arith.constant 0 : i32
    %c0_i32_1 = arith.constant 0 : i32
    return %c0_i32, %c0_i32_0 : i32, i32
  }
  func.func @transform_3(%arg0: i32) -> (i32, i32) {
    %c0_i32 = arith.constant 0 : i32
    %c0_i32_0 = arith.constant 0 : i32
    %c0_i32_1 = arith.constant 0 : i32
    return %c0_i32, %c0_i32_0 : i32, i32
  }
  func.func @transform_4(%arg0: i32) -> (i32, i32) {
    %c0_i32 = arith.constant 0 : i32
    %c0_i32_0 = arith.constant 0 : i32
    %c0_i32_1 = arith.constant 0 : i32
    return %c0_i32, %c0_i32_0 : i32, i32
  }
  func.func @transform_5(%arg0: i32) -> (i32, i32) {
    %c0_i32 = arith.constant 0 : i32
    %c0_i32_0 = arith.constant 0 : i32
    %c0_i32_1 = arith.constant 0 : i32
    return %c0_i32, %c0_i32_0 : i32, i32
  }
  func.func @transform_6(%arg0: i32) -> (i32, i32) {
    %c0_i32 = arith.constant 0 : i32
    %c0_i32_0 = arith.constant 0 : i32
    %c0_i32_1 = arith.constant 0 : i32
    return %c0_i32, %c0_i32_0 : i32, i32
  }
  func.func @transform_7(%arg0: i32) -> (i32, i32) {
    %c0_i32 = arith.constant 0 : i32
    %c0_i32_0 = arith.constant 0 : i32
    %c0_i32_1 = arith.constant 0 : i32
    return %c0_i32, %c0_i32_0 : i32, i32
  }
  func.func @transform_8(%arg0: i32) -> (i32, i32) {
    %c0_i32 = arith.constant 0 : i32
    %c0_i32_0 = arith.constant 0 : i32
    %c0_i32_1 = arith.constant 0 : i32
    return %c0_i32, %c0_i32_0 : i32, i32
  }
  func.func @transform_9(%arg0: i32) -> (i32, i32) {
    %c0_i32 = arith.constant 0 : i32
    %c0_i32_0 = arith.constant 0 : i32
    %c0_i32_1 = arith.constant 0 : i32
    return %c0_i32, %c0_i32_0 : i32, i32
  }
  func.func @transform_10(%arg0: i32) -> (i32, i32) {
    %c0_i32 = arith.constant 0 : i32
    %c0_i32_0 = arith.constant 0 : i32
    %c0_i32_1 = arith.constant 0 : i32
    return %c0_i32, %c0_i32_0 : i32, i32
  }
  func.func @transform_11(%arg0: i32) -> (i32, i32) {
    %c0_i32 = arith.constant 0 : i32
    %c0_i32_0 = arith.constant 0 : i32
    %c0_i32_1 = arith.constant 0 : i32
    return %c0_i32, %c0_i32_0 : i32, i32
  }
  func.func @transform_12(%arg0: i32) -> (i32, i32) {
    %c0_i32 = arith.constant 0 : i32
    %c0_i32_0 = arith.constant 0 : i32
    %c0_i32_1 = arith.constant 0 : i32
    return %c0_i32, %c0_i32_0 : i32, i32
  }
  func.func @transform_13(%arg0: i32) -> (i32, i32) {
    %c0_i32 = arith.constant 0 : i32
    %c0_i32_0 = arith.constant 0 : i32
    return %arg0, %c0_i32 : i32, i32
  }
}

</mosaic_0001>

<bundles_post_ra>
// kernel: red_neuronal5_relu.1
= control target key start
LH: loop header
LB: loop body
LE: loop exit
PB: predicated region body
PF: predicated region fallthrough
CT: control target
= control target key end

     0   :  { %18 = vsyncpa [#allocation3], 0  ;;  %s2677_s0 = inlined_call_operand.vmem [shape: f32[16,64], index: 0, kind: input, shape index: {}]   ;;  %s2678_s1 = inlined_call_operand.hbm [shape: bf16[64,512], index: 1, kind: input, shape index: {}]   ;;  %s2679_s2 = inlined_call_operand.vmem [shape: f32[1,512], index: 2, kind: input, shape index: {}]   ;;  %s2680_s3 = inlined_call_operand.hbm [shape: bf16[512,384], index: 3, kind: input, shape index: {}]   ;;  %s2681_s4 = inlined_call_operand.vmem [shape: f32[1,384], index: 4, kind: input, shape index: {}]   ;;  %s2682_s5 = inlined_call_operand.hbm [shape: bf16[384,128], index: 5, kind: input, shape index: {}]   ;;  %s2683_s6 = inlined_call_operand.vmem [shape: f32[1,128], index: 6, kind: input, shape index: {}]   ;;  %s2684_s7 = inlined_call_operand.vmem [shape: bf16[128,128], index: 7, kind: input, shape index: {}]   ;;  %s2685_s8 = inlined_call_operand.vmem [shape: f32[1,128], index: 8, kind: input, shape index: {}]   ;;  %s2686_s9 = inlined_call_operand.hbm [shape: bf16[128,128], index: 9, kind: input, shape index: {}]   ;;  %s2687_s10 = inlined_call_operand.vmem [shape: f32[1,128], index: 10, kind: input, shape index: {}]   ;;  %s2688_s11 = inlined_call_operand.vmem [shape: bf16[128,10], index: 11, kind: input, shape index: {}]   ;;  %s2689_s12 = inlined_call_operand.vmem [shape: f32[1,10], index: 12, kind: input, shape index: {}]   ;;  %s2690_s13 = inlined_call_operand.vmem [shape: f32[16,10], index: 13, kind: output, shape index: {}]  }
   0x1   :  { %19 = vsyncpa [#allocation5], 0 }
   0x2   :  { %20 = vsyncpa [#allocation8], 0  ;;  %s2440_s25 = smov [#allocation4]  }
   0x3   :  { %s42_s26 = sshll.u32 %s2440_s25, 4  ;;  %s43_s26 = int_to_ptr.vmem [resolvable:$true] %s42_s26 }
   0x4   :  { %s2362_s27 = scalar_lea.vmem %s43_s26, 12288  ;;  %p2367_p1 = scmp.lt.s32.totalorder %s43_s26, %s43_s26 }
   0x5   :  { %p2363_p0 = scmp.ne.s32.totalorder %s43_s26, %s2362_s27  ;;  %p2368_p2 = scmp.lt.s32.totalorder %s2362_s27, %s2362_s27 }
   0x7   :  { %p2369_p3 = por %p2368_p2, %p2367_p1 }
   0x9   :  { %p2370_p4 = pnand %p2369_p3, %p2363_p0 }
   0xb   :  { %2373 = shalt.err (!%p2370_p4)
}
   0xc   :  { %s2441_s28 = smov 192   ;;  %s2442_s29 = smov 12  }
   0xd   :  { %48 = dma.hbm_to_vmem [thread:$0]  %s2680_s3, 12288, %s43_s26, [#allocation5], %s2441_s28, %s2441_s28, %s2442_s29  }
   0xe   :  { %s2443_s15 = smov [#allocation2]  }
   0xf   :  { %s28_s16 = sshll.u32 %s2443_s15, 4  ;;  %s29_s16 = int_to_ptr.vmem [resolvable:$true] %s28_s16 }
  0x10   :  { %s2382_s17 = scalar_lea.vmem %s29_s16, 2048  ;;  %p2387_p6 = scmp.lt.s32.totalorder %s29_s16, %s29_s16 }
  0x11   :  { %p2383_p5 = scmp.ne.s32.totalorder %s29_s16, %s2382_s17  ;;  %p2388_p7 = scmp.lt.s32.totalorder %s2382_s17, %s2382_s17 }
  0x13   :  { %p2389_p8 = por %p2388_p7, %p2387_p6 }
  0x15   :  { %p2390_p9 = pnand %p2389_p8, %p2383_p5 }
  0x17   :  { %2393 = shalt.err (!%p2390_p9)
}
  0x18   :  { %s2444_s18 = smov 256   ;;  %s2445_s19 = smov 16  }
  0x19   :  { %34 = dma.hbm_to_vmem [thread:$0]  %s2678_s1, 2048, %s29_s16, [#allocation3], %s2444_s18, %s2444_s18, %s2445_s19  }
  0x1a   :  { %s2446_s22 = smov [#allocation6]  }
  0x1b   :  { %s56_s23 = sshll.u32 %s2446_s22, 4  ;;  %s57_s23 = int_to_ptr.vmem [resolvable:$true] %s56_s23 }
  0x1c   :  { %s2402_s3 = scalar_lea.vmem %s57_s23, 3072  ;;  %p2407_p11 = scmp.lt.s32.totalorder %s57_s23, %s57_s23 }
  0x1d   :  { %p2403_p10 = scmp.ne.s32.totalorder %s57_s23, %s2402_s3  ;;  %p2408_p12 = scmp.lt.s32.totalorder %s2402_s3, %s2402_s3 }
  0x1f   :  { %p2409_p13 = por %p2408_p12, %p2407_p11 }
  0x21   :  { %p2410_p0 = pnand %p2409_p13, %p2403_p10 }
  0x23   :  { %2413 = shalt.err (!%p2410_p0)
}
  0x24   :  { %s2447_s24 = smov 64   ;;  %s2448_s25 = smov 4  }
  0x25   :  { %62 = dma.hbm_to_vmem [thread:$0]  %s2682_s5, 3072, %s57_s23, [#allocation5], %s2447_s24, %s2447_s24, %s2448_s25  }
  0x26   :  { %s2449_s28 = smov [#allocation7]  }
  0x27   :  { %s74_s29 = sshll.u32 %s2449_s28, 4  ;;  %s75_s29 = int_to_ptr.vmem [resolvable:$true] %s74_s29 }
  0x28   :  { %s2422_s1 = scalar_lea.vmem %s75_s29, 1024  ;;  %p2427_p2 = scmp.lt.s32.totalorder %s75_s29, %s75_s29 }
  0x29   :  { %p2423_p1 = scmp.ne.s32.totalorder %s75_s29, %s2422_s1  ;;  %p2428_p3 = scmp.lt.s32.totalorder %s2422_s1, %s2422_s1 }
  0x2b   :  { %p2429_p4 = por %p2428_p3, %p2427_p2 }
  0x2d   :  { %p2430_p5 = pnand %p2429_p4, %p2423_p1 }
  0x2f   :  { %2433 = shalt.err (!%p2430_p5)
}
  0x30   :  { %80 = dma.hbm_to_vmem [thread:$0]  %s2686_s9, 1024, %s75_s29, [#allocation8], %s2447_s24, %s2447_s24, %s2448_s25  }
  0x31   :  { %2434 = dma.done.wait [#allocation3], 2048  }
  0x32   :  { %2435 = vsyncadd [#allocation3], 4294965248 }
  0x33   :  { %2436 = dma.done.wait [#allocation5], 15360  }
  0x34   :  { %2437 = vsyncadd [#allocation5], 4294951936 }
  0x35   :  { %2438 = dma.done.wait [#allocation8], 1024  }
  0x36   :  { %2439 = vsyncadd [#allocation8], 4294966272  ;;  %v2450_v0 = vmov 0   ;;  %v2154_v1 = vld [vmem:[#allocation2 + $0x64] ss:$16 sps:$4 sm:$0xff]   ;;  %v101_v10 = vld [vmem:[%s2677_s0 + $0x8] sm:$0xff] }
  0x37   :  { %257 = vmatprep.mubr.bf16.mxu1 %v2450_v0  ;;  %v2156_v2 = vld [vmem:[#allocation2 + $0x60] ss:$16 sps:$4 sm:$0xff]   ;;  %233 = vmatprep.subr.bf16.mxu1 %v2154_v1  ;;  %v2157_v3 = vld [vmem:[#allocation2 + $0x44] ss:$16 sps:$4 sm:$0xff]   ;;  %v2168_v11 = vld [vmem:[#allocation2 + $0x6c] ss:$16 sps:$4 sm:$0xff]  }
  0x38   :  { %234 = vmatpush1.bf16.msra.mxu1 %v2156_v2  ;;  %v2159_v4 = vld [vmem:[#allocation2 + $0x40] ss:$16 sps:$4 sm:$0xff]   ;;  %v2160_v5 = vld [vmem:[#allocation2 + $0x24] ss:$16 sps:$4 sm:$0xff]   ;;  %v2178_v12 = vld [vmem:[#allocation4 + $0xac] ss:$12 sps:$4 sm:$0xff]  }
  0x39   :  { %235 = vmatprep.subr.bf16.mxu1 %v2157_v3  ;;  %v2162_v6 = vld [vmem:[#allocation2 + $0x20] ss:$16 sps:$4 sm:$0xff]   ;;  %v2163_v7 = vld [vmem:[#allocation2 + $0x4] ss:$16 sps:$4 sm:$0xff]   ;;  %980 = vmatprep.subr.bf16.mxu0 %v2178_v12  ;;  %vm221_vm0 = vcmask 523264   ;;  %vm2452_vm1 = vmmov 0  }
  0x3a   :  { %v2165_v8 = vld [vmem:[#allocation2] ss:$16 sps:$4 sm:$0xff]   ;;  %v2180_v13 = vld [vmem:[#allocation4 + $0xa8] ss:$12 sps:$4 sm:$0xff]   ;;  %v2171_v17 = vld [vmem:[#allocation2 + $0x4c] ss:$16 sps:$4 sm:$0xff]  }
  0x3b   :  { %v100_v9 = vld [vmem:[%s2677_s0] sm:$0xff]  ;;  %v2166_v16 = vld [vmem:[#allocation2 + $0x68] ss:$16 sps:$4 sm:$0xff]   ;;  %981 = vmatpush1.bf16.msra.mxu0 %v2180_v13  ;;  %v2183_v18 = vld [vmem:[#allocation4 + $0x90] ss:$12 sps:$4 sm:$0xff]   ;;  %vm1783_vm2 = vcmask 80896  }
  0x3c   :  { %236 = vmatpush1.bf16.msra.mxu1 %v2159_v4  ;;  %v2181_v14 = vld [vmem:[#allocation4 + $0x94] ss:$12 sps:$4 sm:$0xff]   ;;  %v102_v15 = vpack.c.bf16 %v101_v10, %v100_v9  ;;  %v2184_v19 = vld [vmem:[#allocation4 + $0x7c] ss:$12 sps:$4 sm:$0xff]   ;;  %v2186_v22 = vld [vmem:[#allocation4 + $0x78] ss:$12 sps:$4 sm:$0xff]  }
  0x3d   :  { %237 = vmatprep.subr.bf16.mxu1 %v2160_v5  ;;  %982 = vmatprep.subr.bf16.mxu0 %v2181_v14  ;;  %v2169_v20 = vld [vmem:[#allocation2 + $0x48] ss:$16 sps:$4 sm:$0xff]   ;;  %v2174_v21 = vld [vmem:[#allocation2 + $0x2c] ss:$16 sps:$4 sm:$0xff]   ;;  %v2187_v23 = vld [vmem:[#allocation4 + $0x64] ss:$12 sps:$4 sm:$0xff]  }
  0x3e   :  { %v2172_v24 = vld [vmem:[#allocation2 + $0x28] ss:$16 sps:$4 sm:$0xff]   ;;  %v2177_v25 = vld [vmem:[#allocation2 + $0xc] ss:$16 sps:$4 sm:$0xff]   ;;  %v2196_v31 = vld [vmem:[#allocation4 + $0x34] ss:$12 sps:$4 sm:$0xff]  }
  0x3f   :  { %983 = vmatpush1.bf16.msra.mxu0 %v2183_v18  ;;  %v2189_v26 = vld [vmem:[#allocation4 + $0x60] ss:$12 sps:$4 sm:$0xff]   ;;  %v2175_v28 = vld [vmem:[#allocation2 + $0x8] ss:$16 sps:$4 sm:$0xff]   ;;  %v2201_v34 = vld [vmem:[#allocation4 + $0x30] ss:$12 sps:$4 sm:$0xff]  }
  0x40   :  { %238 = vmatpush1.bf16.msra.mxu1 %v2162_v6  ;;  %984 = vmatprep.subr.bf16.mxu0 %v2184_v19  ;;  %v2190_v27 = vld [vmem:[#allocation4 + $0x4c] ss:$12 sps:$4 sm:$0xff]   ;;  %v2195_v30 = vld [vmem:[#allocation4 + $0x48] ss:$12 sps:$4 sm:$0xff]   ;;  %v2198_v36 = vld [vmem:[#allocation4 + $0x210] ss:$12 sps:$4 sm:$0xff]  }
  0x41   :  { %239 = vmatprep.subr.bf16.mxu1 %v2163_v7  ;;  %v2194_v29 = vld [vmem:[#allocation4 + $0x22c] ss:$12 sps:$4 sm:$0xff]   ;;  %v2192_v32 = vld [vmem:[#allocation4 + $0x228] ss:$12 sps:$4 sm:$0xff]   ;;  %v2208_v39 = vld [vmem:[#allocation4 + $0x4] ss:$12 sps:$4 sm:$0xff]  }
  0x42   :  { %v2200_v33 = vld [vmem:[#allocation4 + $0x214] ss:$12 sps:$4 sm:$0xff]   ;;  %v2202_v35 = vld [vmem:[#allocation4 + $0x1c] ss:$12 sps:$4 sm:$0xff]   ;;  %v2207_v38 = vld [vmem:[#allocation4 + $0x18] ss:$12 sps:$4 sm:$0xff]  }
  0x43   :  { %985 = vmatpush1.bf16.msra.mxu0 %v2186_v22  ;;  %v2206_v37 = vld [vmem:[#allocation4 + $0x1fc] ss:$12 sps:$4 sm:$0xff]   ;;  %v2204_v40 = vld [vmem:[#allocation4 + $0x1f8] ss:$12 sps:$4 sm:$0xff]   ;;  %v2213_v42 = vld [vmem:[#allocation4] ss:$12 sps:$4 sm:$0xff]   ;;  %v121_v22 = vlaneseq }
  0x44   :  { %240 = vmatpush1.bf16.msra.mxu1 %v2165_v8  ;;  %986 = vmatprep.subr.bf16.mxu0 %v2187_v23  ;;  %v2212_v41 = vld [vmem:[#allocation4 + $0x1e4] ss:$12 sps:$4 sm:$0xff]   ;;  %v2214_v43 = vld [vmem:[#allocation4 + $0x16c] ss:$12 sps:$4 sm:$0xff]   ;;  %v2219_v46 = vld [vmem:[#allocation4 + $0x168] ss:$12 sps:$4 sm:$0xff]  }
  0x45   :  { %276 = vmatprep.subr.bf16.mxu1 %v2168_v11  ;;  %v2210_v44 = vld [vmem:[#allocation4 + $0x1e0] ss:$12 sps:$4 sm:$0xff]   ;;  %v2216_v48 = vld [vmem:[#allocation4 + $0x1c8] ss:$12 sps:$4 sm:$0xff]   ;;  %v2225_v50 = vld [vmem:[#allocation4 + $0x150] ss:$12 sps:$4 sm:$0xff]  }
  0x46   :  { %v2218_v45 = vld [vmem:[#allocation4 + $0x1cc] ss:$12 sps:$4 sm:$0xff]   ;;  %v2220_v47 = vld [vmem:[#allocation4 + $0x154] ss:$12 sps:$4 sm:$0xff]   ;;  %v2226_v51 = vld [vmem:[#allocation4 + $0x13c] ss:$12 sps:$4 sm:$0xff]  }
  0x47   :  { %1809 = vmatmul.mubr.msk.bf16.vlgmr.msra.gmra.mxu1 %vm221_vm0, %v102_v15  ;;  %987 = vmatpush1.bf16.msra.mxu0 %v2189_v26  ;;  %v2224_v49 = vld [vmem:[#allocation4 + $0x1b4] ss:$12 sps:$4 sm:$0xff]   ;;  %v2222_v52 = vld [vmem:[#allocation4 + $0x1b0] ss:$12 sps:$4 sm:$0xff]   ;;  %v2231_v54 = vld [vmem:[#allocation4 + $0x138] ss:$12 sps:$4 sm:$0xff]  }
  0x48   :  { %277 = vmatpush1.bf16.msra.mxu1 %v2166_v16  ;;  %300 = vmatprep.mubr.bf16.mxu1 %v2450_v0  ;;  %v2230_v53 = vld [vmem:[#allocation4 + $0x19c] ss:$12 sps:$4 sm:$0xff]   ;;  %v2232_v55 = vld [vmem:[#allocation4 + $0x124] ss:$12 sps:$4 sm:$0xff]   ;;  %v2237_v58 = vld [vmem:[#allocation4 + $0x120] ss:$12 sps:$4 sm:$0xff]  }
  0x49   :  { %278 = vmatprep.subr.bf16.mxu1 %v2171_v17  ;;  %988 = vmatprep.subr.bf16.mxu0 %v2190_v27  ;;  %v2228_v56 = vld [vmem:[#allocation4 + $0x198] ss:$12 sps:$4 sm:$0xff]   ;;  %v2234_v60 = vld [vmem:[#allocation4 + $0x180] ss:$12 sps:$4 sm:$0xff]   ;;  %v2243_v62 = vld [vmem:[#allocation4 + $0x108] ss:$12 sps:$4 sm:$0xff]  }
  0x4a   :  { %v2236_v57 = vld [vmem:[#allocation4 + $0x184] ss:$12 sps:$4 sm:$0xff]   ;;  %v2238_v59 = vld [vmem:[#allocation4 + $0x10c] ss:$12 sps:$4 sm:$0xff]   ;;  %v2240_v63 = vld [vmem:[#allocation4 + $0x2e8] ss:$12 sps:$4 sm:$0xff]  }
  0x4b   :  { %989 = vmatpush1.bf16.msra.mxu0 %v2195_v30  ;;  %v2242_v61 = vld [vmem:[#allocation4 + $0x2ec] ss:$12 sps:$4 sm:$0xff]   ;;  %v2244_v0 = vld [vmem:[#allocation4 + $0xf4] ss:$12 sps:$4 sm:$0xff]   ;;  %v2246_v2 = vld [vmem:[#allocation4 + $0x2d0] ss:$12 sps:$4 sm:$0xff]  }
  0x4c   :  { %279 = vmatpush1.bf16.msra.mxu1 %v2169_v20  ;;  %990 = vmatprep.subr.bf16.mxu0 %v2196_v31  ;;  %v2248_v1 = vld [vmem:[#allocation4 + $0x2d4] ss:$12 sps:$4 sm:$0xff]   ;;  %v2249_v3 = vld [vmem:[#allocation4 + $0xf0] ss:$12 sps:$4 sm:$0xff]   ;;  %v2252_v6 = vld [vmem:[#allocation4 + $0x2b8] ss:$12 sps:$4 sm:$0xff]  }
  0x4d   :  { %280 = vmatprep.subr.bf16.mxu1 %v2174_v21  ;;  %v2250_v4 = vld [vmem:[#allocation4 + $0xdc] ss:$12 sps:$4 sm:$0xff]   ;;  %v2255_v7 = vld [vmem:[#allocation4 + $0xd8] ss:$12 sps:$4 sm:$0xff]   ;;  %v2258_v10 = vld [vmem:[#allocation4 + $0x2a0] ss:$12 sps:$4 sm:$0xff]  }
  0x4e   :  { %v2254_v5 = vld [vmem:[#allocation4 + $0x2bc] ss:$12 sps:$4 sm:$0xff]   ;;  %v2256_v8 = vld [vmem:[#allocation4 + $0xc4] ss:$12 sps:$4 sm:$0xff]   ;;  %v2261_v11 = vld [vmem:[#allocation4 + $0xc0] ss:$12 sps:$4 sm:$0xff]  }
  0x4f   :  { %991 = vmatpush1.bf16.msra.mxu0 %v2201_v34  ;;  %v2260_v9 = vld [vmem:[#allocation4 + $0x2a4] ss:$12 sps:$4 sm:$0xff]   ;;  %v2264_v12 = vld [vmem:[#allocation4 + $0x28c] ss:$12 sps:$4 sm:$0xff]   ;;  %v2262_v14 = vld [vmem:[#allocation4 + $0x288] ss:$12 sps:$4 sm:$0xff]  }
  0x50   :  { %281 = vmatpush1.bf16.msra.mxu1 %v2172_v24  ;;  %992 = vmatprep.subr.bf16.mxu0 %v2202_v35  ;;  %v2265_v13 = vld [vmem:[#allocation4 + $0x170] ss:$12 sps:$4 sm:$0xff]   ;;  %v2272_v18 = vld [vmem:[#allocation4 + $0x258] ss:$12 sps:$4 sm:$0xff]   ;;  %v2277_v20 = vld [vmem:[#allocation4 + $0x240] ss:$12 sps:$4 sm:$0xff]  }
  0x51   :  { %282 = vmatprep.subr.bf16.mxu1 %v2177_v25  ;;  %v2267_v16 = vld [vmem:[#allocation4 + $0x270] ss:$12 sps:$4 sm:$0xff]   ;;  %v2543_v23 = vshrl.u32 %v121_v22, 7  ;;  %v119_v25 = vld [vmem:[%s2679_s2] sm:$0xf] }
  0x52   :  { %v2274_v17 = vld [vmem:[#allocation4 + $0x25c] ss:$12 sps:$4 sm:$0xff]   ;;  %v2279_v19 = vld [vmem:[#allocation4 + $0x244] ss:$12 sps:$4 sm:$0xff]  }
  0x53   :  { %993 = vmatpush1.bf16.msra.mxu0 %v2207_v38  ;;  %v2283_v21 = vld [vmem:[#allocation4 + $0x2f0] ss:$12 sps:$4 sm:$0xff]   ;;  %v127_v24 = vsub.s32 1, %v2543_v23  ;;  %v123_v26 = vsub.s32 0, %v2543_v23 }
  0x54   :  { %283 = vmatpush1.bf16.msra.mxu1 %v2175_v28  ;;  %994 = vmatprep.subr.bf16.mxu0 %v2208_v39  ;;  %v2307_v22 = vld [vmem:[#allocation6 + $0x38] sm:$0xff]  }
  0x55   :  { %1023 = vmatprep.subr.bf16.mxu1 %v2194_v29  ;;  %v128_v28 = vrot.slane %v119_v25, %v127_v24  ;;  %v124_v29 = vrot.slane %v119_v25, %v123_v26 }
  0x57   :  { %1810 = vmatmul.mubr.msk.bf16.vlgmr.msra.gmra.mxu1 %vm221_vm0, %v102_v15  ;;  %995 = vmatpush1.bf16.msra.mxu0 %v2213_v42  ;;  %v2269_v15 = vld [vmem:[#allocation4 + $0x274] ss:$12 sps:$4 sm:$0xff]   ;;  %v2266_v42 = vld [vmem:[#allocation4 + $0xb0] ss:$12 sps:$4 sm:$0xff]  }
  0x58   :  { %1024 = vmatpush1.bf16.msra.mxu1 %v2192_v32  ;;  %996 = vmatprep.subr.bf16.mxu0 %v2214_v43 }
  0x59   :  { %1025 = vmatprep.subr.bf16.mxu1 %v2200_v33 }
  0x5b   :  { %997 = vmatpush2.bf16.msra.mxu0 %v2219_v46  ;;  %v131_v46 = vsub.s32 2, %v2543_v23 }
  0x5c   :  { %1026 = vmatpush1.bf16.msra.mxu1 %v2198_v36  ;;  %998 = vmatprep.subr.bf16.mxu0 %v2220_v47  ;;  %v2271_v47 = vld [vmem:[#allocation4 + $0x98] ss:$12 sps:$4 sm:$0xff]  }
  0x5d   :  { %1027 = vmatprep.subr.bf16.mxu1 %v2206_v37 }
  0x5f   :  { %999 = vmatpush2.bf16.msra.mxu0 %v2225_v50 }
  0x60   :  { %1028 = vmatpush1.bf16.msra.mxu1 %v2204_v40  ;;  %1000 = vmatprep.subr.bf16.mxu0 %v2226_v51  ;;  %v132_v51 = vrot.slane %v119_v25, %v131_v46 }
  0x61   :  { %1029 = vmatprep.subr.bf16.mxu1 %v2212_v41 }
  0x63   :  { %1001 = vmatpush2.bf16.msra.mxu0 %v2231_v54 }
  0x64   :  { %1030 = vmatpush1.bf16.msra.mxu1 %v2210_v44  ;;  %1002 = vmatprep.subr.bf16.mxu0 %v2232_v55  ;;  %v2270_v44 = vld [vmem:[#allocation4 + $0x158] ss:$12 sps:$4 sm:$0xff]   ;;  %v2280_v55 = vld [vmem:[#allocation4 + $0x128] ss:$12 sps:$4 sm:$0xff]  }
  0x65   :  { %1031 = vmatprep.subr.bf16.mxu1 %v2218_v45  ;;  %v135_v45 = vsub.s32 3, %v2543_v23  ;;  %v2330_v23 = vld [vmem:[%s2684_s7 + $0x38] sm:$0xff]  }
  0x67   :  { %1003 = vmatpush2.bf16.msra.mxu0 %v2237_v58  ;;  %v136_v50 = vrot.slane %v119_v25, %v135_v45  ;;  %v2300_v25 = vld [vmem:[#allocation4 + $0x278] ss:$12 sps:$4 sm:$0xff]  }
  0x68   :  { %1032 = vmatpush1.bf16.msra.mxu1 %v2216_v48  ;;  %1004 = vmatprep.subr.bf16.mxu0 %v2238_v59  ;;  %v2321_v45 = vld [vmem:[#allocation6] sm:$0xff]  }
  0x69   :  { %1033 = vmatprep.subr.bf16.mxu1 %v2224_v49  ;;  %v2275_v49 = vld [vmem:[#allocation4 + $0x140] ss:$12 sps:$4 sm:$0xff]  }
  0x6b   :  { %1005 = vmatpush2.bf16.msra.mxu0 %v2243_v62 }
  0x6c   :  { %1034 = vmatpush1.bf16.msra.mxu1 %v2222_v52  ;;  %1006 = vmatprep.subr.bf16.mxu0 %v2244_v0 }
  0x6d   :  { %1035 = vmatprep.subr.bf16.mxu1 %v2230_v53  ;;  %v2276_v53 = vld [vmem:[#allocation4 + $0x80] ss:$12 sps:$4 sm:$0xff]  }
  0x6f   :  { %1007 = vmatpush2.bf16.msra.mxu0 %v2249_v3 }
  0x70   :  { %1036 = vmatpush1.bf16.msra.mxu1 %v2228_v56  ;;  %1008 = vmatprep.subr.bf16.mxu0 %v2250_v4  ;;  %v2284_v4 = vld [vmem:[#allocation4 + $0x50] ss:$12 sps:$4 sm:$0xff]  }
  0x71   :  { %1037 = vmatprep.subr.bf16.mxu1 %v2236_v57 }
  0x73   :  { %1009 = vmatpush2.bf16.msra.mxu0 %v2255_v7  ;;  %v2286_v7 = vld [vmem:[#allocation4 + $0xf8] ss:$12 sps:$4 sm:$0xff]  }
  0x74   :  { %1038 = vmatpush1.bf16.msra.mxu1 %v2234_v60  ;;  %1010 = vmatprep.subr.bf16.mxu0 %v2256_v8  ;;  %v2287_v8 = vld [vmem:[#allocation4 + $0x2d8] ss:$12 sps:$4 sm:$0xff]  }
  0x75   :  { %1039 = vmatprep.subr.bf16.mxu1 %v2242_v61  ;;  %v2281_v61 = vld [vmem:[#allocation4 + $0x68] ss:$12 sps:$4 sm:$0xff]  }
  0x77   :  { %1011 = vmatpush2.bf16.msra.mxu0 %v2261_v11  ;;  %v2290_v11 = vld [vmem:[#allocation4 + $0xe0] ss:$12 sps:$4 sm:$0xff]  }
  0x78   :  { %1040 = vmatpush2.bf16.msra.mxu1 %v2240_v63  ;;  %1959 = vmatprep.subr.bf16.mxu0 %v2265_v13  ;;  %v2282_v63 = vld [vmem:[#allocation4 + $0x110] ss:$12 sps:$4 sm:$0xff]   ;;  %v2292_v13 = vld [vmem:[#allocation4 + $0x20] ss:$12 sps:$4 sm:$0xff]  }
  0x79   :  { %1041 = vmatprep.subr.bf16.mxu1 %v2248_v1 }
  0x7c   :  { %1042 = vmatpush2.bf16.msra.mxu1 %v2246_v2 }
  0x7d   :  { %1043 = vmatprep.subr.bf16.mxu1 %v2254_v5  ;;  %v2285_v5 = vld [vmem:[#allocation4 + $0x230] ss:$12 sps:$4 sm:$0xff]  }
  0x80   :  { %1044 = vmatpush2.bf16.msra.mxu1 %v2252_v6 }
  0x81   :  { %1045 = vmatprep.subr.bf16.mxu1 %v2260_v9  ;;  %v2288_v9 = vld [vmem:[#allocation4 + $0x38] ss:$12 sps:$4 sm:$0xff]  }
  0x84   :  { %1046 = vmatpush2.bf16.msra.mxu1 %v2258_v10  ;;  %v2289_v10 = vld [vmem:[#allocation4 + $0x218] ss:$12 sps:$4 sm:$0xff]  }
  0x85   :  { %1047 = vmatprep.subr.bf16.mxu1 %v2264_v12  ;;  %v2291_v12 = vld [vmem:[#allocation4 + $0x2c0] ss:$12 sps:$4 sm:$0xff]  }
  0x88   :  { %1048 = vmatpush2.bf16.msra.mxu1 %v2262_v14  ;;  %v2293_v14 = vld [vmem:[#allocation4 + $0x200] ss:$12 sps:$4 sm:$0xff]  }
  0x89   :  { %1049 = vmatprep.subr.bf16.mxu1 %v2269_v15  ;;  %v2294_v15 = vld [vmem:[#allocation4 + $0xc8] ss:$12 sps:$4 sm:$0xff]  }
  0x8c   :  { %1050 = vmatpush2.bf16.msra.mxu1 %v2267_v16  ;;  %v2295_v16 = vld [vmem:[#allocation4 + $0x2a8] ss:$12 sps:$4 sm:$0xff]  }
  0x8d   :  { %1051 = vmatprep.subr.bf16.mxu1 %v2274_v17  ;;  %v2296_v17 = vld [vmem:[#allocation4 + $0x8] ss:$12 sps:$4 sm:$0xff]  }
  0x90   :  { %1052 = vmatpush2.bf16.msra.mxu1 %v2272_v18  ;;  %v2297_v18 = vld [vmem:[#allocation4 + $0x1e8] ss:$12 sps:$4 sm:$0xff]  }
  0x91   :  { %1053 = vmatprep.subr.bf16.mxu1 %v2279_v19  ;;  %v2298_v19 = vld [vmem:[#allocation4 + $0x290] ss:$12 sps:$4 sm:$0xff]  }
  0x94   :  { %1054 = vmatpush2.bf16.msra.mxu1 %v2277_v20  ;;  %v2306_v20 = vld [vmem:[#allocation6 + $0x78] sm:$0xff]  }
  0x95   :  { %1981 = vmatprep.subr.bf16.mxu1 %v2283_v21  ;;  %v2299_v21 = vld [vmem:[#allocation4 + $0x1d0] ss:$12 sps:$4 sm:$0xff]  }
 0x107   :  { %v259_v27 = vpop.f32.mrf.mxu1 }
 0x108   :  { %v260_v34 = vadd.f32 %v259_v27, %v124_v29  ;;  %v2301_v27 = vld [vmem:[#allocation4 + $0x1b8] ss:$12 sps:$4 sm:$0xff]  }
 0x109   :  { %v261_v30 = vpop.f32.mrf.mxu1 }
 0x10a   :  { %v262_v32 = vadd.f32 %v261_v30, %v128_v28  ;;  %v311_v40 = vmax.f32 %v260_v34, 0.0  ;;  %v2304_v30 = vld [vmem:[#allocation4 + $0x248] ss:$12 sps:$4 sm:$0xff]  }
 0x10b   :  { %v263_v31 = vpop.f32.mrf.mxu1  ;;  %v2310_v34 = vld [vmem:[#allocation6 + $0x68] sm:$0xff]  }
 0x10c   :  { %v264_v33 = vadd.f32 %v263_v31, %v124_v29  ;;  %v312_v38 = vmax.f32 %v262_v32, 0.0  ;;  %v2303_v29 = vld [vmem:[#allocation4 + $0x1a0] ss:$12 sps:$4 sm:$0xff]   ;;  %v2305_v31 = vld [vmem:[#allocation4 + $0x188] ss:$12 sps:$4 sm:$0xff]  }
 0x10d   :  { %v265_v35 = vpop.f32.mrf.mxu1  ;;  %v2308_v32 = vld [vmem:[#allocation6 + $0x70] sm:$0xff]  }
 0x10e   :  { %v266_v36 = vadd.f32 %v265_v35, %v128_v28  ;;  %v315_v37 = vmax.f32 %v264_v33, 0.0  ;;  %v2302_v28 = vld [vmem:[#allocation4 + $0x260] ss:$12 sps:$4 sm:$0xff]   ;;  %v2309_v33 = vld [vmem:[#allocation6 + $0x30] sm:$0xff]  }
 0x10f   :  { %v2311_v35 = vld [vmem:[#allocation6 + $0x28] sm:$0xff]  }
 0x110   :  { %v316_v39 = vmax.f32 %v266_v36, 0.0  ;;  %v2554_v43 = vpack.c.bf16 %v315_v37, %v311_v40  ;;  %v2312_v36 = vld [vmem:[#allocation6 + $0x60] sm:$0xff]   ;;  %v2316_v40 = vld [vmem:[#allocation6 + $0x50] sm:$0xff]  }
 0x111   :  { %v2313_v37 = vld [vmem:[#allocation6 + $0x20] sm:$0xff]  }
 0x112   :  { %v320_v41 = vpack.c.bf16 %v316_v39, %v312_v38  ;;  %v2314_v38 = vld [vmem:[#allocation6 + $0x58] sm:$0xff]  }
 0x113   :  { %v2315_v39 = vld [vmem:[#allocation6 + $0x18] sm:$0xff]  }
 0x114   :  { %1012 = vmatprep.mubr.bf16.mxu0 %v320_v41 }
 0x115   :  { %1013 = vmatmul.mubr.bf16.vlgmr.msra.gmra.mxu0 %v2554_v43 }
 0x116   :  { %1960 = vmatpush3.bf16.msra.mxu0 %v2266_v42  ;;  %1098 = vmatprep.mubr.bf16.mxu0 %v320_v41  ;;  %v2317_v41 = vld [vmem:[#allocation6 + $0x10] sm:$0xff]   ;;  %v2318_v42 = vld [vmem:[#allocation6 + $0x48] sm:$0xff]  }
 0x117   :  { %v302_v48 = vpop.f32.mrf.mxu1  ;;  %1961 = vmatprep.subr.bf16.mxu0 %v2270_v44  ;;  %v2320_v44 = vld [vmem:[#allocation6 + $0x40] sm:$0xff]  }
 0x118   :  { %v303_v58 = vadd.f32 %v302_v48, %v132_v51  ;;  %v2451_v48 = vmov 0.0  }
 0x119   :  { %v304_v52 = vpop.f32.mrf.mxu1 }
 0x11a   :  { %1962 = vmatpush3.bf16.msra.mxu0 %v2271_v47  ;;  %v305_v56 = vadd.f32 %v304_v52, %v136_v50  ;;  %v313_v2 = vmax.f32 %v303_v58, 0.0  ;;  %v2322_v47 = vld [vmem:[#allocation6 + $0xb8] sm:$0xff]   ;;  %v451_v58 = vld [vmem:[%s2681_s4] sm:$0x7] }
 0x11b   :  { %v306_v54 = vpop.f32.mrf.mxu1  ;;  %1963 = vmatprep.subr.bf16.mxu0 %v2275_v49  ;;  %v2323_v49 = vld [vmem:[#allocation6 + $0xb0] sm:$0xff]   ;;  %v2326_v52 = vld [vmem:[#allocation6 + $0x98] sm:$0xff]  }
 0x11c   :  { %v307_v57 = vadd.f32 %v306_v54, %v132_v51  ;;  %v314_v0 = vmax.f32 %v305_v56, 0.0  ;;  %v2325_v51 = vld [vmem:[#allocation6 + $0xa0] sm:$0xff]   ;;  %v2328_v54 = vld [vmem:[#allocation6 + $0x88] sm:$0xff]  }
 0x11d   :  { %v308_v59 = vpop.f32.mrf.mxu1 }
 0x11e   :  { %v309_v60 = vadd.f32 %v308_v59, %v136_v50  ;;  %1964 = vmatpush3.bf16.msra.mxu0 %v2276_v53  ;;  %v317_v62 = vmax.f32 %v307_v57, 0.0  ;;  %v2324_v50 = vld [vmem:[#allocation6 + $0xa8] sm:$0xff]   ;;  %v2327_v53 = vld [vmem:[#allocation6 + $0x90] sm:$0xff]  }
 0x11f   :  { %1965 = vmatprep.subr.bf16.mxu0 %v2280_v55  ;;  %v2329_v55 = vld [vmem:[#allocation6 + $0x80] sm:$0xff]  }
 0x120   :  { %v318_v1 = vmax.f32 %v309_v60, 0.0  ;;  %v321_v6 = vpack.c.bf16 %v317_v62, %v313_v2  ;;  %v460_v60 = vrot.slane %v451_v58, %v127_v24 }
 0x122   :  { %v322_v3 = vpack.c.bf16 %v318_v1, %v314_v0  ;;  %1966 = vmatpush3.bf16.msra.mxu0 %v2281_v61  ;;  %v456_v61 = vrot.slane %v451_v58, %v123_v26 }
 0x123   :  { %1967 = vmatprep.subr.bf16.mxu0 %v2282_v63 }
 0x124   :  { %1055 = vmatprep.mubr.bf16.mxu1 %v322_v3 }
 0x125   :  { %1056 = vmatmul.mubr.bf16.vlgmr.msra.gmra.mxu1 %v321_v6 }
 0x126   :  { %1968 = vmatpush3.bf16.msra.mxu0 %v2284_v4  ;;  %1982 = vmatpush3.bf16.msra.mxu1 %v2285_v5 }
 0x127   :  { %1139 = vmatprep.mubr.bf16.mxu1 %v322_v3  ;;  %1969 = vmatprep.subr.bf16.mxu0 %v2286_v7 }
 0x128   :  { %1983 = vmatprep.subr.bf16.mxu1 %v2287_v8 }
 0x12a   :  { %1970 = vmatpush3.bf16.msra.mxu0 %v2288_v9  ;;  %1984 = vmatpush3.bf16.msra.mxu1 %v2289_v10 }
 0x12b   :  { %1971 = vmatprep.subr.bf16.mxu0 %v2290_v11  ;;  %1985 = vmatprep.subr.bf16.mxu1 %v2291_v12 }
 0x12e   :  { %1972 = vmatpush3.bf16.msra.mxu0 %v2292_v13  ;;  %1986 = vmatpush3.bf16.msra.mxu1 %v2293_v14 }
 0x12f   :  { %1973 = vmatprep.subr.bf16.mxu0 %v2294_v15  ;;  %1987 = vmatprep.subr.bf16.mxu1 %v2295_v16 }
 0x132   :  { %1974 = vmatpush3.bf16.msra.mxu0 %v2296_v17  ;;  %1988 = vmatpush3.bf16.msra.mxu1 %v2297_v18 }
 0x133   :  { %1989 = vmatprep.subr.bf16.mxu1 %v2298_v19  ;;  %2003 = vmatprep.subr.bf16.mxu0 %v2306_v20  ;;  %v464_v20 = vrot.slane %v451_v58, %v131_v46  ;;  %v2331_v46 = vld [vmem:[%s2684_s7 + $0x30] sm:$0xff]  }
 0x135   :  { %1099 = vmatmul.mubr.bf16.vlgmr.msra.gmra.mxu0 %v2554_v43  ;;  %v2319_v43 = vld [vmem:[#allocation6 + $0x8] sm:$0xff]  }
 0x136   :  { %1990 = vmatpush3.bf16.msra.mxu1 %v2299_v21  ;;  %2004 = vmatpush3.bf16.msra.mxu0 %v2307_v22 }
 0x137   :  { %1991 = vmatprep.subr.bf16.mxu1 %v2300_v25  ;;  %2005 = vmatprep.subr.bf16.mxu0 %v2308_v32 }
 0x13a   :  { %1992 = vmatpush3.bf16.msra.mxu1 %v2301_v27  ;;  %2006 = vmatpush3.bf16.msra.mxu0 %v2309_v33 }
 0x13b   :  { %1993 = vmatprep.subr.bf16.mxu1 %v2302_v28  ;;  %2007 = vmatprep.subr.bf16.mxu0 %v2310_v34 }
 0x13e   :  { %1994 = vmatpush3.bf16.msra.mxu1 %v2303_v29  ;;  %2008 = vmatpush3.bf16.msra.mxu0 %v2311_v35 }
 0x13f   :  { %1995 = vmatprep.subr.bf16.mxu1 %v2304_v30  ;;  %2009 = vmatprep.subr.bf16.mxu0 %v2312_v36 }
 0x142   :  { %1996 = vmatpush3.bf16.msra.mxu1 %v2305_v31  ;;  %2010 = vmatpush3.bf16.msra.mxu0 %v2313_v37 }
 0x143   :  { %2011 = vmatprep.subr.bf16.mxu0 %v2314_v38  ;;  %2061 = vmatprep.subr.bf16.mxu1 %v2451_v48  ;;  %v2332_v38 = vld [vmem:[%s2684_s7 + $0x28] sm:$0xff]  }
 0x145   :  { %1140 = vmatmul.mubr.bf16.vlgmr.msra.gmra.mxu1 %v321_v6 }
 0x146   :  { %2012 = vmatpush3.bf16.msra.mxu0 %v2315_v39  ;;  %2062 = vmatpush3.bf16.msra.mxu1 %v2322_v47  ;;  %v2333_v39 = vld [vmem:[%s2684_s7 + $0x20] sm:$0xff]   ;;  %v2340_v47 = vld [vmem:[#allocation7 + $0x28] sm:$0xff]  }
 0x147   :  { %2013 = vmatprep.subr.bf16.mxu0 %v2316_v40  ;;  %2063 = vmatprep.subr.bf16.mxu1 %v2451_v48  ;;  %v2334_v40 = vld [vmem:[%s2684_s7 + $0x18] sm:$0xff]  }
 0x148   :  { %2077 = vmatprep.mubr.msk.bf16.mxu1 %vm2452_vm1, %v2451_v48 }
 0x14a   :  { %2014 = vmatpush3.bf16.msra.mxu0 %v2317_v41  ;;  %2064 = vmatpush3.bf16.msra.mxu1 %v2323_v49  ;;  %v2335_v41 = vld [vmem:[%s2684_s7 + $0x10] sm:$0xff]   ;;  %v2341_v49 = vld [vmem:[#allocation7 + $0x20] sm:$0xff]  }
 0x14b   :  { %2015 = vmatprep.subr.bf16.mxu0 %v2318_v42  ;;  %2065 = vmatprep.subr.bf16.mxu1 %v2451_v48  ;;  %v2336_v42 = vld [vmem:[%s2684_s7 + $0x8] sm:$0xff]  }
 0x14e   :  { %2016 = vmatpush3.bf16.msra.mxu0 %v2319_v43  ;;  %2066 = vmatpush3.bf16.msra.mxu1 %v2324_v50  ;;  %v2337_v43 = vld [vmem:[%s2684_s7] sm:$0xff]   ;;  %v2342_v50 = vld [vmem:[#allocation7 + $0x18] sm:$0xff]  }
 0x14f   :  { %2017 = vmatprep.subr.bf16.mxu0 %v2320_v44  ;;  %2067 = vmatprep.subr.bf16.mxu1 %v2451_v48  ;;  %v2338_v44 = vld [vmem:[#allocation7 + $0x38] sm:$0xff]  }
 0x152   :  { %2018 = vmatpush3.bf16.msra.mxu0 %v2321_v45  ;;  %2068 = vmatpush3.bf16.msra.mxu1 %v2325_v51  ;;  %v2339_v45 = vld [vmem:[#allocation7 + $0x30] sm:$0xff]  }
 0x153   :  { %2081 = vmatprep.subr.bf16.mxu0 %v2451_v48  ;;  %2069 = vmatprep.subr.bf16.mxu1 %v2451_v48 }
 0x156   :  { %2070 = vmatpush3.bf16.msra.mxu1 %v2326_v52 }
 0x157   :  { %2071 = vmatprep.subr.bf16.mxu1 %v2451_v48 }
 0x15a   :  { %2072 = vmatpush3.bf16.msra.mxu1 %v2327_v53 }
 0x15b   :  { %2073 = vmatprep.subr.bf16.mxu1 %v2451_v48 }
 0x15e   :  { %2074 = vmatpush3.bf16.msra.mxu1 %v2328_v54 }
 0x15f   :  { %2075 = vmatprep.subr.bf16.mxu1 %v2451_v48 }
 0x162   :  { %2076 = vmatpush3.bf16.msra.mxu1 %v2329_v55 }
 0x163   :  { %2101 = vmatprep.subr.bf16.mxu1 %v2451_v48 }
 0x1d5   :  { %v1014_v56 = vpop.f32.mrf.mxu0 }
 0x1d6   :  { %v1015_v3 = vadd.f32 %v1014_v56, %v456_v61  ;;  %v1907_v56 = vld [vmem:[%s2683_s6] ss:$0 sm:$0xff] }
 0x1d7   :  { %v1016_v57 = vpop.f32.mrf.mxu0 }
 0x1d8   :  { %v1017_v1 = vadd.f32 %v1016_v57, %v460_v60 }
 0x1d9   :  { %v1018_v59 = vpop.f32.mrf.mxu0 }
 0x1da   :  { %v1019_v2 = vadd.f32 %v1018_v59, %v456_v61 }
 0x1db   :  { %v1020_v63 = vpop.f32.mrf.mxu0 }
 0x1dc   :  { %v1021_v5 = vadd.f32 %v1020_v63, %v460_v60 }
 0x1e5   :  { %v1057_v62 = vpop.f32.mrf.mxu1 }
 0x1e6   :  { %v1058_v8 = vadd.f32 %v1057_v62, %v1015_v3 }
 0x1e7   :  { %v1059_v0 = vpop.f32.mrf.mxu1 }
 0x1e8   :  { %v1060_v6 = vadd.f32 %v1059_v0, %v1017_v1  ;;  %v1148_v24 = vmax.f32 %v1058_v8, 0.0  ;;  %v2346_v8 = vld [vmem:[%s2688_s11 + $0x38] sm:$0xff]  }
 0x1e9   :  { %v1061_v4 = vpop.f32.mrf.mxu1 }
 0x1ea   :  { %v1062_v7 = vadd.f32 %v1061_v4, %v1019_v2  ;;  %v1149_v12 = vmax.f32 %v1060_v6, 0.0  ;;  %v2344_v6 = vld [vmem:[#allocation7 + $0x8] sm:$0xff]  }
 0x1eb   :  { %v1063_v9 = vpop.f32.mrf.mxu1 }
 0x1ec   :  { %v1064_v10 = vadd.f32 %v1063_v9, %v1021_v5  ;;  %v1151_v11 = vmax.f32 %v1062_v7, 0.0  ;;  %v2343_v5 = vld [vmem:[#allocation7 + $0x10] sm:$0xff]   ;;  %v2345_v7 = vld [vmem:[#allocation7] sm:$0xff]  }
 0x1ed   :  { %v2347_v9 = vld [vmem:[%s2688_s11 + $0x30] sm:$0xff]  }
 0x1ee   :  { %v1152_v13 = vmax.f32 %v1064_v10, 0.0  ;;  %v1154_v15 = vpack.c.bf16 %v1151_v11, %v1148_v24  ;;  %v2348_v10 = vld [vmem:[%s2688_s11 + $0x28] sm:$0xff]   ;;  %v2349_v11 = vld [vmem:[%s2688_s11 + $0x20] sm:$0xff]  }
 0x1f0   :  { %v1155_v14 = vpack.c.bf16 %v1152_v13, %v1149_v12  ;;  %v2350_v12 = vld [vmem:[%s2688_s11 + $0x18] sm:$0xff]   ;;  %v1932_v13 = vld [vmem:[%s2685_s8] ss:$0 sm:$0xff] }
 0x1f2   :  { %1388 = vmatprep.mubr.bf16.mxu0 %v1155_v14 }
 0x1f3   :  { %1389 = vmatmul.mubr.bf16.vlgmr.msra.gmra.mxu0 %v1154_v15 }
 0x1f4   :  { %2097 = vmatprep.mubr.msk.bf16.mxu0 %vm2452_vm1, %v2451_v48  ;;  %2082 = vmatpush3.bf16.msra.mxu0 %v2330_v23 }
 0x1f5   :  { %v1975_v26 = vpop.f32.mrf.mxu0  ;;  %2083 = vmatprep.subr.bf16.mxu0 %v2451_v48 }
 0x1f7   :  { %v1976_v16 = vpop.f32.mrf.mxu0 }
 0x1f8   :  { %v1977_v21 = vadd.f32 %v1976_v16, %v1975_v26  ;;  %2084 = vmatpush3.bf16.msra.mxu0 %v2331_v46 }
 0x1f9   :  { %v1978_v17 = vpop.f32.mrf.mxu0  ;;  %2085 = vmatprep.subr.bf16.mxu0 %v2451_v48 }
 0x1fa   :  { %v1101_v29 = vadd.f32 %v1977_v21, %v464_v20  ;;  %v2351_v21 = vld [vmem:[%s2688_s11 + $0x10] sm:$0xff]  }
 0x1fb   :  { %v1979_v18 = vpop.f32.mrf.mxu0 }
 0x1fc   :  { %v1980_v25 = vadd.f32 %v1979_v18, %v1978_v17  ;;  %2086 = vmatpush3.bf16.msra.mxu0 %v2332_v38 }
 0x1fd   :  { %2087 = vmatprep.subr.bf16.mxu0 %v2451_v48 }
 0x1fe   :  { %v1104_v31 = vadd.f32 %v1980_v25, %v464_v20  ;;  %v2353_v25 = vld [vmem:[%s2688_s11] sm:$0xff]  }
 0x200   :  { %2088 = vmatpush3.bf16.msra.mxu0 %v2333_v39 }
 0x201   :  { %2089 = vmatprep.subr.bf16.mxu0 %v2451_v48 }
 0x204   :  { %2090 = vmatpush3.bf16.msra.mxu0 %v2334_v40 }
 0x205   :  { %v1997_v19 = vpop.f32.mrf.mxu1  ;;  %2091 = vmatprep.subr.bf16.mxu0 %v2451_v48 }
 0x207   :  { %v1998_v22 = vpop.f32.mrf.mxu1 }
 0x208   :  { %v1999_v27 = vadd.f32 %v1998_v22, %v1997_v19  ;;  %2092 = vmatpush3.bf16.msra.mxu0 %v2335_v41  ;;  %v2352_v22 = vld [vmem:[%s2688_s11 + $0x8] sm:$0xff]  }
 0x209   :  { %v2000_v28 = vpop.f32.mrf.mxu1  ;;  %2093 = vmatprep.subr.bf16.mxu0 %v2451_v48 }
 0x20a   :  { %v1142_v32 = vadd.f32 %v1999_v27, %v1101_v29  ;;  %v1941_v27 = vld [vmem:[%s2687_s10] ss:$0 sm:$0xff] }
 0x20b   :  { %v2001_v30 = vpop.f32.mrf.mxu1 }
 0x20c   :  { %v2002_v33 = vadd.f32 %v2001_v30, %v2000_v28  ;;  %v1150_v35 = vmax.f32 %v1142_v32, 0.0  ;;  %2094 = vmatpush3.bf16.msra.mxu0 %v2336_v42 }
 0x20d   :  { %2095 = vmatprep.subr.bf16.mxu0 %v2451_v48 }
 0x20e   :  { %v1145_v34 = vadd.f32 %v2002_v33, %v1104_v31 }
 0x210   :  { %v1153_v36 = vmax.f32 %v1145_v34, 0.0  ;;  %2096 = vmatpush3.bf16.msra.mxu0 %v2337_v43 }
 0x211   :  { %2121 = vmatprep.subr.bf16.mxu0 %v2451_v48 }
 0x212   :  { %v1156_v37 = vpack.c.bf16 %v1153_v36, %v1150_v35 }
 0x214   :  { %2078 = vmatmul.mubr.bf16.vlgmr.msra.gmra.mxu1 %v1156_v37 }
 0x215   :  { %2117 = vmatprep.mubr.msk.bf16.mxu1 %vm2452_vm1, %v2451_v48  ;;  %2102 = vmatpush3.bf16.msra.mxu1 %v2338_v44 }
 0x216   :  { %2103 = vmatprep.subr.bf16.mxu1 %v2451_v48 }
 0x219   :  { %2104 = vmatpush3.bf16.msra.mxu1 %v2339_v45 }
 0x21a   :  { %2105 = vmatprep.subr.bf16.mxu1 %v2451_v48 }
 0x21d   :  { %2106 = vmatpush3.bf16.msra.mxu1 %v2340_v47 }
 0x21e   :  { %2107 = vmatprep.subr.bf16.mxu1 %v2451_v48 }
 0x221   :  { %2108 = vmatpush3.bf16.msra.mxu1 %v2341_v49 }
 0x222   :  { %2109 = vmatprep.subr.bf16.mxu1 %v2451_v48 }
 0x225   :  { %2110 = vmatpush3.bf16.msra.mxu1 %v2342_v50 }
 0x226   :  { %2111 = vmatprep.subr.bf16.mxu1 %v2451_v48 }
 0x229   :  { %2112 = vmatpush3.bf16.msra.mxu1 %v2343_v5 }
 0x22a   :  { %2113 = vmatprep.subr.bf16.mxu1 %v2451_v48 }
 0x22d   :  { %2114 = vmatpush3.bf16.msra.mxu1 %v2344_v6 }
 0x22e   :  { %2115 = vmatprep.subr.bf16.mxu1 %v2451_v48 }
 0x231   :  { %2116 = vmatpush3.bf16.msra.mxu1 %v2345_v7 }
 0x2b3   :  { %v2019_v51 = vpop.f32.mrf.mxu0 }
 0x2b5   :  { %v2020_v52 = vpop.f32.mrf.mxu0 }
 0x2b6   :  { %v2021_v55 = vadd.f32 %v2020_v52, %v2019_v51 }
 0x2b7   :  { %v2022_v53 = vpop.f32.mrf.mxu0 }
 0x2b8   :  { %v1391_v59 = vadd.f32 %v2021_v55, %v1907_v56 }
 0x2b9   :  { %v2023_v54 = vpop.f32.mrf.mxu0 }
 0x2ba   :  { %v2024_v57 = vadd.f32 %v2023_v54, %v2022_v53 }
 0x2bc   :  { %v1394_v62 = vadd.f32 %v2024_v57, %v1907_v56 }
 0x2d4   :  { %v1431_v58 = vpop.f32.mrf.mxu1 }
 0x2d5   :  { %v1432_v61 = vadd.f32 %v1431_v58, %v1391_v59 }
 0x2d6   :  { %v2079_v60 = vpop.f32.mrf.mxu1 }
 0x2d7   :  { %v1438_v2 = vmax.f32 %v1432_v61, 0.0 }
 0x2d8   :  { %v1434_v63 = vpop.f32.mrf.mxu1 }
 0x2d9   :  { %v1435_v0 = vadd.f32 %v1434_v63, %v1394_v62 }
 0x2da   :  { %v2080_v1 = vpop.f32.mrf.mxu1 }
 0x2db   :  { %v1439_v3 = vmax.f32 %v1435_v0, 0.0 }
 0x2dd   :  { %v1440_v4 = vpack.c.bf16 %v1439_v3, %v1438_v2 }
 0x2df   :  { %2098 = vmatmul.mubr.bf16.vlgmr.msra.gmra.mxu0 %v1440_v4 }
 0x2e0   :  { %2137 = vmatprep.mubr.msk.bf16.mxu0 %vm2452_vm1, %v2451_v48  ;;  %2122 = vmatpush3.bf16.msra.mxu0 %v2346_v8 }
 0x2e1   :  { %2123 = vmatprep.subr.bf16.mxu0 %v2451_v48 }
 0x2e4   :  { %2124 = vmatpush3.bf16.msra.mxu0 %v2347_v9 }
 0x2e5   :  { %2125 = vmatprep.subr.bf16.mxu0 %v2451_v48 }
 0x2e8   :  { %2126 = vmatpush3.bf16.msra.mxu0 %v2348_v10 }
 0x2e9   :  { %2127 = vmatprep.subr.bf16.mxu0 %v2451_v48 }
 0x2ec   :  { %2128 = vmatpush3.bf16.msra.mxu0 %v2349_v11 }
 0x2ed   :  { %2129 = vmatprep.subr.bf16.mxu0 %v2451_v48 }
 0x2f0   :  { %2130 = vmatpush3.bf16.msra.mxu0 %v2350_v12 }
 0x2f1   :  { %2131 = vmatprep.subr.bf16.mxu0 %v2451_v48 }
 0x2f4   :  { %2132 = vmatpush3.bf16.msra.mxu0 %v2351_v21 }
 0x2f5   :  { %2133 = vmatprep.subr.bf16.mxu0 %v2451_v48 }
 0x2f8   :  { %2134 = vmatpush3.bf16.msra.mxu0 %v2352_v22 }
 0x2f9   :  { %2135 = vmatprep.subr.bf16.mxu0 %v2451_v48  ;;  %v1950_v48 = vld [vmem:[%s2689_s12] ss:$0 sm:$0xff] }
 0x2fc   :  { %2136 = vmatpush3.bf16.msra.mxu0 %v2353_v25 }
 0x39f   :  { %v1546_v24 = vpop.f32.mrf.mxu0 }
 0x3a0   :  { %v1547_v15 = vadd.f32 %v1932_v13, %v1546_v24 }
 0x3a1   :  { %v2099_v14 = vpop.f32.mrf.mxu0 }
 0x3a2   :  { %v1553_v18 = vmax.f32 %v1547_v15, 0.0 }
 0x3a3   :  { %v1549_v26 = vpop.f32.mrf.mxu0 }
 0x3a4   :  { %v1550_v16 = vadd.f32 %v1932_v13, %v1549_v26 }
 0x3a5   :  { %v2100_v17 = vpop.f32.mrf.mxu0 }
 0x3a6   :  { %v1554_v19 = vmax.f32 %v1550_v16, 0.0 }
 0x3a8   :  { %v1555_v20 = vpack.c.bf16 %v1554_v19, %v1553_v18 }
 0x3aa   :  { %2118 = vmatmul.mubr.bf16.vlgmr.msra.gmra.mxu1 %v1555_v20 }
 0x46a   :  { %v1661_v28 = vpop.f32.mrf.mxu1 }
 0x46b   :  { %v1662_v30 = vadd.f32 %v1941_v27, %v1661_v28 }
 0x46c   :  { %v2119_v29 = vpop.f32.mrf.mxu1 }
 0x46d   :  { %v1668_v34 = vmax.f32 %v1662_v30, 0.0 }
 0x46e   :  { %v1664_v31 = vpop.f32.mrf.mxu1 }
 0x46f   :  { %v1665_v32 = vadd.f32 %v1941_v27, %v1664_v31 }
 0x470   :  { %v2120_v33 = vpop.f32.mrf.mxu1 }
 0x471   :  { %v1669_v35 = vmax.f32 %v1665_v32, 0.0 }
 0x473   :  { %v1670_v36 = vpack.c.bf16 %v1669_v35, %v1668_v34 }
 0x475   :  { %2138 = vmatmul.mubr.bf16.vlgmr.msra.gmra.mxu0 %v1670_v36 }
 0x535   :  { %v1776_v37 = vpop.f32.mrf.mxu0 }
 0x536   :  { %v1777_v23 = vadd.f32 %v1950_v48, %v1776_v37 }
 0x537   :  { %v2139_v46 = vpop.f32.mrf.mxu0 }
 0x538   :  { %1784 = vst.msk [vmem:[%s2690_s13] sm:$0xff] %vm1783_vm2, %v1777_v23 }
 0x539   :  { %v1779_v38 = vpop.f32.mrf.mxu0 }
 0x53a   :  { %v1780_v39 = vadd.f32 %v1950_v48, %v1779_v38 }
 0x53b   :  { %v2140_v40 = vpop.f32.mrf.mxu0 }
 0x53c   :  { %1785 = vst.msk [vmem:[%s2690_s13 + $0x8] sm:$0xff] %vm1783_vm2, %v1780_v39 }
 0x53d   :  { %1790 = vsyncpa [#allocation3], 1 }
 0x53e   :  { %1791 = vsyncpa [#allocation5], 1 }
 0x53f   :  { %1792 = vsyncpa [#allocation8], 1 }

</bundles_post_ra>
